<compile_context>
chip_gen: v5e
topology: v5e:2x2
jax: 0.10.0
libtpu: 0.0.40
codegen_flags: <defaults>
</compile_context>

<pallas_src>
import jax
import jax.numpy as jnp
from jax.experimental import pallas as pl
from jax.experimental.pallas import tpu as pltpu


# --------------------------------------------------------------------------
# Kernels
# --------------------------------------------------------------------------
def _make_vpu_kernel(C, Cr):
    """Small-C pixel-attention kernel on a (1, C, s_tile, 128) activation block.

    Weights / biases / channel-attention arrive via SMEM and are applied as
    scalar-broadcast FMAs so the whole body is full-vreg VPU + EUP work.
    """

    def kernel(xca_ref, w1_ref, b1_ref, w2_ref, b2_ref, x_ref, out_ref):
        n = pl.program_id(1)                                 # batch index
        # Load each channel slab once, in f32 (no-op cast for f32 inputs).
        xs = [x_ref[0, c].astype(jnp.float32) for c in range(C)]   # C x (s,128)

        # Layer 1: h_r = relu(sum_c w1[r, c] * x_c + b1[r])
        hs = []
        for r in range(Cr):
            acc = w1_ref[r, 0] * xs[0]
            for c in range(1, C):
                acc = acc + w1_ref[r, c] * xs[c]
            hs.append(jnp.maximum(acc + b1_ref[r], 0.0))

        # Layer 2 + sigmoid + channel-attention scale + final sigmoid.
        for c in range(C):
            acc = w2_ref[c, 0] * hs[0]
            for r in range(1, Cr):
                acc = acc + w2_ref[c, r] * hs[r]
            pa = jax.nn.sigmoid(acc + b2_ref[c])
            # TODO(synk): if the EUP slot binds on v7x (bundle dump), rewrite
            # both sigmoids as exp(-x) + pl.reciprocal(1 + e, approx=True).
            out_ref[0, c] = jax.nn.sigmoid(xca_ref[n, c] * pa).astype(out_ref.dtype)

    return kernel


def _make_mxu_kernel():
    """Larger-C pixel-attention kernel on a (1, C, hw_tile) activation block.

    bf16 MXU operands with f32 accumulation (native MXU throughput on
    v6e/v7x); elementwise epilogue stays in f32.
    """

    def kernel(xca_ref, w1_ref, b1_ref, w2_ref, b2_ref, x_ref, out_ref):
        x = x_ref[0].astype(jnp.bfloat16)                    # (C, THW)
        h = jnp.dot(w1_ref[...], x, preferred_element_type=jnp.float32)
        h = jnp.maximum(h + b1_ref[...], 0.0)
        # NOTE: bf16 re-cast of h trades ~1e-3 precision for native MXU speed;
        # only relevant if a large-C configuration ever becomes compute-bound.
        pa = jnp.dot(w2_ref[...], h.astype(jnp.bfloat16),
                     preferred_element_type=jnp.float32) + b2_ref[...]
        pa = jax.nn.sigmoid(pa)
        x_ca = xca_ref[0]                                    # (C, 1) f32
        out_ref[0] = jax.nn.sigmoid(x_ca * pa).astype(out_ref.dtype)

    return kernel


# --------------------------------------------------------------------------
# Generation-aware sizing
# --------------------------------------------------------------------------
def _chip_budgets():
    """Returns (vmem_limit_bytes, activation_tile_budget_bytes)."""
    try:
        cap = int(pltpu.get_tpu_info().vmem_capacity_bytes)
    except Exception:               # unknown part / emulator: assume smallest VMEM
        cap = 64 << 20
    if cap >= (96 << 20):           # v5e / v6e: 128 MiB VMEM per TensorCore
        return 64 << 20, 28 << 20
    return 40 << 20, 14 << 20       # v7x: 64 MiB VMEM per TensorCore


def _pick_sublane_tile(S, C, in_bytes, out_bytes, act_budget):
    """Sublane tile (multiple of 8, or full S) for the (N, C, S, 128) layout."""
    # Per sublane of a tile: double-buffered in+out activations plus the f32
    # intermediates (x casts, h slabs, accumulators) that live in VMEM/vregs.
    per_sublane = 128 * (2 * C * (in_bytes + out_bytes) + 4 * (2 * C + 2))
    cap = max(8, (act_budget // per_sublane) // 8 * 8)
    return S if S <= cap else cap


def _pick_lane_tile(HW, C, in_bytes, out_bytes, act_budget):
    """Lane tile (multiple of 128, or full HW) for the (N, C, HW) layout."""
    per_lane = 2 * C * (in_bytes + out_bytes) + 4 * (2 * C + 2)
    cap = max(128, (act_budget // per_lane) // 128 * 128)
    return HW if HW <= cap else cap


def _round_up(x, m):
    return (x + m - 1) // m * m


# --------------------------------------------------------------------------
# Wrapper
# --------------------------------------------------------------------------
@jax.jit
def attn_forward(x_nchw, params):
    """x_nchw: (N, C, H, W). Returns sigmoid(x_ca * x_pa), same dtype as input."""
    N, C, H, W = x_nchw.shape
    HW = H * W
    Cr = params["w1_pa"].shape[0]
    out_dtype = x_nchw.dtype                 # f32 in -> f32 out, bf16 in -> bf16 out
    io_bytes = x_nchw.dtype.itemsize

    x3 = x_nchw.reshape(N, C, HW)            # lane-dense pixel axis, no transpose

    # ---- channel-attention branch: tiny (N, C); plain JAX in the wrapper ----
    x_pool = jnp.mean(x3.astype(jnp.float32), axis=2)                    # (N, C)
    h_ca = jnp.maximum(x_pool @ params["w1_ca"].T + params["b1_ca"], 0.0)
    x_ca = jax.nn.sigmoid(h_ca @ params["w2_ca"].T + params["b2_ca"])    # (N, C) f32

    vmem_limit, act_budget = _chip_budgets()
    use_vpu = (C <= 8 and Cr <= 8)

    if use_vpu:
        # ---- small C: sublane-packed (N, C, S, 128) layout, SMEM scalar weights ----
        S0 = max(1, _round_up(HW, 128) // 128)
        s_tile = _pick_sublane_tile(S0, C, io_bytes, io_bytes, act_budget)
        S = _round_up(S0, s_tile)
        HWp = S * 128
        xp = x3 if HWp == HW else jnp.pad(x3, ((0, 0), (0, 0), (0, HWp - HW)))
        x4 = xp.reshape(N, C, S, 128)
        n_tiles = S // s_tile

        smem = pl.BlockSpec(memory_space=pltpu.MemorySpace.SMEM)
        out = pl.pallas_call(
            _make_vpu_kernel(C, Cr),
            out_shape=jax.ShapeDtypeStruct((N, C, S, 128), out_dtype),
            grid=(n_tiles, N),               # tile axis first -> megacore split (v7x)
            in_specs=[
                smem,                        # x_ca  (N, C)  f32 scalars
                smem,                        # w1_pa (Cr, C)
                smem,                        # b1_pa (Cr,)
                smem,                        # w2_pa (C, Cr)
                smem,                        # b2_pa (C,)
                pl.BlockSpec((1, C, s_tile, 128), lambda t, n: (n, 0, t, 0)),
            ],
            out_specs=pl.BlockSpec((1, C, s_tile, 128), lambda t, n: (n, 0, t, 0)),
            compiler_params=pltpu.CompilerParams(
                dimension_semantics=("parallel", "parallel"),
                vmem_limit_bytes=vmem_limit,
            ),
        )(
            x_ca,
            params["w1_pa"].astype(jnp.float32),
            params["b1_pa"].astype(jnp.float32),
            params["w2_pa"].astype(jnp.float32),
            params["b2_pa"].astype(jnp.float32),
            x4,
        )
        out = out.reshape(N, C, HWp)
    else:
        # ---- larger C: lane-dense (N, C, HW_tile) layout, bf16 MXU matmuls ----
        hw_tile = _pick_lane_tile(_round_up(HW, 128), C, io_bytes, io_bytes,
                                  act_budget)
        HWp = _round_up(HW, hw_tile)
        xp = x3 if HWp == HW else jnp.pad(x3, ((0, 0), (0, 0), (0, HWp - HW)))
        n_tiles = HWp // hw_tile

        const = lambda shape: pl.BlockSpec(shape, lambda t, n: (0,) * len(shape))
        # TODO(synk): on 128 MiB parts, sweep pl.Buffered(3) on the x/out specs.
        out = pl.pallas_call(
            _make_mxu_kernel(),
            out_shape=jax.ShapeDtypeStruct((N, C, HWp), out_dtype),
            grid=(n_tiles, N),
            in_specs=[
                pl.BlockSpec((1, C, 1), lambda t, n: (n, 0, 0)),        # x_ca
                const((Cr, C)),                                         # w1_pa bf16
                const((Cr, 1)),                                         # b1_pa f32
                const((C, Cr)),                                         # w2_pa bf16
                const((C, 1)),                                          # b2_pa f32
                pl.BlockSpec((1, C, hw_tile), lambda t, n: (n, 0, t)),  # x tile
            ],
            out_specs=pl.BlockSpec((1, C, hw_tile), lambda t, n: (n, 0, t)),
            compiler_params=pltpu.CompilerParams(
                dimension_semantics=("parallel", "parallel"),
                vmem_limit_bytes=vmem_limit,
            ),
        )(
            x_ca[:, :, None],
            params["w1_pa"].astype(jnp.bfloat16),
            params["b1_pa"].reshape(Cr, 1).astype(jnp.float32),
            params["w2_pa"].astype(jnp.bfloat16),
            params["b2_pa"].reshape(C, 1).astype(jnp.float32),
            xp,
        )

    if HWp != HW:
        out = out[:, :, :HW]
    return out.reshape(N, C, H, W)


# --------------------------------------------------------------------------
# Params / reference
# --------------------------------------------------------------------------
def init_params(key, channel, reduction=2):
    """Deterministic synthetic init. Conv2d(out,in,1,1) weights stored as (out,in)."""
    cr = channel // reduction
    ks = jax.random.split(key, 8)
    s1 = 1.0 / jnp.sqrt(channel)
    s2 = 1.0 / jnp.sqrt(cr)
    f32 = jnp.float32
    return {
        "w1_ca": (jax.random.normal(ks[0], (cr, channel)) * s1).astype(f32),
        "b1_ca": (jax.random.normal(ks[1], (cr,)) * s1).astype(f32),
        "w2_ca": (jax.random.normal(ks[2], (channel, cr)) * s2).astype(f32),
        "b2_ca": (jax.random.normal(ks[3], (channel,)) * s2).astype(f32),
        "w1_pa": (jax.random.normal(ks[4], (cr, channel)) * s1).astype(f32),
        "b1_pa": (jax.random.normal(ks[5], (cr,)) * s1).astype(f32),
        "w2_pa": (jax.random.normal(ks[6], (channel, cr)) * s2).astype(f32),
        "b2_pa": (jax.random.normal(ks[7], (channel,)) * s2).astype(f32),
    }


def attn_reference(x_nchw, p):
    """Pure-JAX f32 reference matching the PyTorch forward."""
    x = x_nchw.astype(jnp.float32)
    x_pool = jnp.mean(x, axis=(2, 3))                                    # (N, C)

    def mlp(v, w1, b1, w2, b2):
        h = jnp.maximum(jnp.einsum("...c,rc->...r", v, w1) + b1, 0.0)
        return jax.nn.sigmoid(jnp.einsum("...r,cr->...c", h, w2) + b2)

    x_ca = mlp(x_pool, p["w1_ca"], p["b1_ca"], p["w2_ca"], p["b2_ca"])   # (N, C)
    x_nhwc = jnp.transpose(x, (0, 2, 3, 1))
    x_pa = mlp(x_nhwc, p["w1_pa"], p["b1_pa"], p["w2_pa"], p["b2_pa"])   # (N,H,W,C)
    m = jax.nn.sigmoid(x_ca[:, None, None, :] * x_pa)
    return jnp.transpose(m, (0, 3, 1, 2))


if __name__ == "__main__":
    N, C, H, W = 2, 4, 16, 16
    reduction = 2

    key = jax.random.PRNGKey(0)
    kx, kp = jax.random.split(key)
    x = jax.random.normal(kx, (N, C, H, W), dtype=jnp.float32)
    params = init_params(kp, C, reduction)

    out = jax.block_until_ready(attn_forward(x, params))
    ref = jax.block_until_ready(attn_reference(x, params))

    assert out.shape == (N, C, H, W)
    err = float(jnp.max(jnp.abs(out.astype(jnp.float32) - ref)))
    assert err < 1e-4, f"mismatch vs reference: {err}"

    print("KERNEL_OK")
</pallas_src>

<mosaic_0001>
module attributes {stable_mosaic.version = 11 : i64} {
  func.func @kernel(%arg0: i32, %arg1: i32, %arg2: memref<2x4xf32, #tpu.memory_space<smem>>, %arg3: memref<2x4xf32, #tpu.memory_space<smem>>, %arg4: memref<2xf32, #tpu.memory_space<smem>>, %arg5: memref<4x2xf32, #tpu.memory_space<smem>>, %arg6: memref<4xf32, #tpu.memory_space<smem>>, %arg7: memref<1x4x2x128xf32, #tpu.memory_space<vmem>>, %arg8: memref<1x4x2x128xf32, #tpu.memory_space<vmem>>) attributes {dimension_semantics = [#tpu.dimension_semantics<parallel>, #tpu.dimension_semantics<parallel>], iteration_bounds = array<i64: 1, 2>, scalar_prefetch = 0 : i64, scratch_operands = 0 : i64, tpu.core_type = #tpu.core_type<tc>, window_params = [{transform_indices = @transform_0, window_bounds = array<i64: 2, 4>}, {transform_indices = @transform_1, window_bounds = array<i64: 2, 4>}, {transform_indices = @transform_2, window_bounds = array<i64: 2>}, {transform_indices = @transform_3, window_bounds = array<i64: 4, 2>}, {transform_indices = @transform_4, window_bounds = array<i64: 4>}, {transform_indices = @transform_5, window_bounds = array<i64: 1, 4, 2, 128>}, {transform_indices = @transform_6, window_bounds = array<i64: 1, 4, 2, 128>}]} {
    %c0 = arith.constant 0 : index
    %c0_0 = arith.constant 0 : index
    %c0_1 = arith.constant 0 : index
    %c0_2 = arith.constant 0 : index
    %0 = vector.load %arg7[%c0, %c0_0, %c0_1, %c0_2] : memref<1x4x2x128xf32, #tpu.memory_space<vmem>>, vector<1x1x2x128xf32>
    %1 = vector.shape_cast %0 : vector<1x1x2x128xf32> to vector<2x128xf32>
    %c0_3 = arith.constant 0 : index
    %c1 = arith.constant 1 : index
    %c0_4 = arith.constant 0 : index
    %c0_5 = arith.constant 0 : index
    %2 = vector.load %arg7[%c0_3, %c1, %c0_4, %c0_5] : memref<1x4x2x128xf32, #tpu.memory_space<vmem>>, vector<1x1x2x128xf32>
    %3 = vector.shape_cast %2 : vector<1x1x2x128xf32> to vector<2x128xf32>
    %c0_6 = arith.constant 0 : index
    %c2 = arith.constant 2 : index
    %c0_7 = arith.constant 0 : index
    %c0_8 = arith.constant 0 : index
    %4 = vector.load %arg7[%c0_6, %c2, %c0_7, %c0_8] : memref<1x4x2x128xf32, #tpu.memory_space<vmem>>, vector<1x1x2x128xf32>
    %5 = vector.shape_cast %4 : vector<1x1x2x128xf32> to vector<2x128xf32>
    %c0_9 = arith.constant 0 : index
    %c3 = arith.constant 3 : index
    %c0_10 = arith.constant 0 : index
    %c0_11 = arith.constant 0 : index
    %6 = vector.load %arg7[%c0_9, %c3, %c0_10, %c0_11] : memref<1x4x2x128xf32, #tpu.memory_space<vmem>>, vector<1x1x2x128xf32>
    %7 = vector.shape_cast %6 : vector<1x1x2x128xf32> to vector<2x128xf32>
    %c0_12 = arith.constant 0 : index
    %c0_13 = arith.constant 0 : index
    %8 = memref.load %arg3[%c0_12, %c0_13] : memref<2x4xf32, #tpu.memory_space<smem>>
    %9 = vector.broadcast %8 : f32 to vector<2x128xf32>
    %10 = arith.mulf %9, %1 : vector<2x128xf32>
    %c0_14 = arith.constant 0 : index
    %c1_15 = arith.constant 1 : index
    %11 = memref.load %arg3[%c0_14, %c1_15] : memref<2x4xf32, #tpu.memory_space<smem>>
    %12 = vector.broadcast %11 : f32 to vector<2x128xf32>
    %13 = arith.mulf %12, %3 : vector<2x128xf32>
    %14 = arith.addf %10, %13 : vector<2x128xf32>
    %c0_16 = arith.constant 0 : index
    %c2_17 = arith.constant 2 : index
    %15 = memref.load %arg3[%c0_16, %c2_17] : memref<2x4xf32, #tpu.memory_space<smem>>
    %16 = vector.broadcast %15 : f32 to vector<2x128xf32>
    %17 = arith.mulf %16, %5 : vector<2x128xf32>
    %18 = arith.addf %14, %17 : vector<2x128xf32>
    %c0_18 = arith.constant 0 : index
    %c3_19 = arith.constant 3 : index
    %19 = memref.load %arg3[%c0_18, %c3_19] : memref<2x4xf32, #tpu.memory_space<smem>>
    %20 = vector.broadcast %19 : f32 to vector<2x128xf32>
    %21 = arith.mulf %20, %7 : vector<2x128xf32>
    %22 = arith.addf %18, %21 : vector<2x128xf32>
    %c0_20 = arith.constant 0 : index
    %23 = memref.load %arg4[%c0_20] : memref<2xf32, #tpu.memory_space<smem>>
    %24 = vector.broadcast %23 : f32 to vector<2x128xf32>
    %25 = arith.addf %22, %24 : vector<2x128xf32>
    %cst = arith.constant 0.000000e+00 : f32
    %26 = vector.broadcast %cst : f32 to vector<2x128xf32>
    %27 = arith.maximumf %25, %26 : vector<2x128xf32>
    %c1_21 = arith.constant 1 : index
    %c0_22 = arith.constant 0 : index
    %28 = memref.load %arg3[%c1_21, %c0_22] : memref<2x4xf32, #tpu.memory_space<smem>>
    %29 = vector.broadcast %28 : f32 to vector<2x128xf32>
    %30 = arith.mulf %29, %1 : vector<2x128xf32>
    %c1_23 = arith.constant 1 : index
    %c1_24 = arith.constant 1 : index
    %31 = memref.load %arg3[%c1_23, %c1_24] : memref<2x4xf32, #tpu.memory_space<smem>>
    %32 = vector.broadcast %31 : f32 to vector<2x128xf32>
    %33 = arith.mulf %32, %3 : vector<2x128xf32>
    %34 = arith.addf %30, %33 : vector<2x128xf32>
    %c1_25 = arith.constant 1 : index
    %c2_26 = arith.constant 2 : index
    %35 = memref.load %arg3[%c1_25, %c2_26] : memref<2x4xf32, #tpu.memory_space<smem>>
    %36 = vector.broadcast %35 : f32 to vector<2x128xf32>
    %37 = arith.mulf %36, %5 : vector<2x128xf32>
    %38 = arith.addf %34, %37 : vector<2x128xf32>
    %c1_27 = arith.constant 1 : index
    %c3_28 = arith.constant 3 : index
    %39 = memref.load %arg3[%c1_27, %c3_28] : memref<2x4xf32, #tpu.memory_space<smem>>
    %40 = vector.broadcast %39 : f32 to vector<2x128xf32>
    %41 = arith.mulf %40, %7 : vector<2x128xf32>
    %42 = arith.addf %38, %41 : vector<2x128xf32>
    %c1_29 = arith.constant 1 : index
    %43 = memref.load %arg4[%c1_29] : memref<2xf32, #tpu.memory_space<smem>>
    %44 = vector.broadcast %43 : f32 to vector<2x128xf32>
    %45 = arith.addf %42, %44 : vector<2x128xf32>
    %cst_30 = arith.constant 0.000000e+00 : f32
    %46 = vector.broadcast %cst_30 : f32 to vector<2x128xf32>
    %47 = arith.maximumf %45, %46 : vector<2x128xf32>
    %c0_31 = arith.constant 0 : index
    %c0_32 = arith.constant 0 : index
    %48 = memref.load %arg5[%c0_31, %c0_32] : memref<4x2xf32, #tpu.memory_space<smem>>
    %49 = vector.broadcast %48 : f32 to vector<2x128xf32>
    %50 = arith.mulf %49, %27 : vector<2x128xf32>
    %c0_33 = arith.constant 0 : index
    %c1_34 = arith.constant 1 : index
    %51 = memref.load %arg5[%c0_33, %c1_34] : memref<4x2xf32, #tpu.memory_space<smem>>
    %52 = vector.broadcast %51 : f32 to vector<2x128xf32>
    %53 = arith.mulf %52, %47 : vector<2x128xf32>
    %54 = arith.addf %50, %53 : vector<2x128xf32>
    %c0_35 = arith.constant 0 : index
    %55 = memref.load %arg6[%c0_35] : memref<4xf32, #tpu.memory_space<smem>>
    %56 = vector.broadcast %55 : f32 to vector<2x128xf32>
    %57 = arith.addf %54, %56 : vector<2x128xf32>
    %58 = arith.negf %57 : vector<2x128xf32>
    %59 = math.exp %58 : vector<2x128xf32>
    %cst_36 = arith.constant 1.000000e+00 : f32
    %60 = vector.broadcast %cst_36 : f32 to vector<2x128xf32>
    %61 = arith.addf %60, %59 : vector<2x128xf32>
    %62 = arith.divf %60, %61 : vector<2x128xf32>
    %63 = arith.index_cast %arg1 : i32 to index
    %c0_37 = arith.constant 0 : index
    %64 = memref.load %arg2[%63, %c0_37] : memref<2x4xf32, #tpu.memory_space<smem>>
    %65 = vector.broadcast %64 : f32 to vector<2x128xf32>
    %66 = arith.mulf %65, %62 : vector<2x128xf32>
    %67 = arith.negf %66 : vector<2x128xf32>
    %68 = math.exp %67 : vector<2x128xf32>
    %cst_38 = arith.constant 1.000000e+00 : f32
    %69 = vector.broadcast %cst_38 : f32 to vector<2x128xf32>
    %70 = arith.addf %69, %68 : vector<2x128xf32>
    %71 = arith.divf %69, %70 : vector<2x128xf32>
    %c0_39 = arith.constant 0 : index
    %c0_40 = arith.constant 0 : index
    %c0_41 = arith.constant 0 : index
    %c0_42 = arith.constant 0 : index
    %72 = vector.load %arg8[%c0_39, %c0_40, %c0_41, %c0_42] : memref<1x4x2x128xf32, #tpu.memory_space<vmem>>, vector<1x1x2x128xf32>
    %73 = vector.shape_cast %72 : vector<1x1x2x128xf32> to vector<2x128xf32>
    %74 = vector.shape_cast %71 : vector<2x128xf32> to vector<1x1x2x128xf32>
    tpu.vector_store %arg8[%c0_39, %c0_40, %c0_41, %c0_42], %74 {strides = array<i32>} : memref<1x4x2x128xf32, #tpu.memory_space<vmem>>, vector<1x1x2x128xf32>,
    %c1_43 = arith.constant 1 : index
    %c0_44 = arith.constant 0 : index
    %75 = memref.load %arg5[%c1_43, %c0_44] : memref<4x2xf32, #tpu.memory_space<smem>>
    %76 = vector.broadcast %75 : f32 to vector<2x128xf32>
    %77 = arith.mulf %76, %27 : vector<2x128xf32>
    %c1_45 = arith.constant 1 : index
    %c1_46 = arith.constant 1 : index
    %78 = memref.load %arg5[%c1_45, %c1_46] : memref<4x2xf32, #tpu.memory_space<smem>>
    %79 = vector.broadcast %78 : f32 to vector<2x128xf32>
    %80 = arith.mulf %79, %47 : vector<2x128xf32>
    %81 = arith.addf %77, %80 : vector<2x128xf32>
    %c1_47 = arith.constant 1 : index
    %82 = memref.load %arg6[%c1_47] : memref<4xf32, #tpu.memory_space<smem>>
    %83 = vector.broadcast %82 : f32 to vector<2x128xf32>
    %84 = arith.addf %81, %83 : vector<2x128xf32>
    %85 = arith.negf %84 : vector<2x128xf32>
    %86 = math.exp %85 : vector<2x128xf32>
    %cst_48 = arith.constant 1.000000e+00 : f32
    %87 = vector.broadcast %cst_48 : f32 to vector<2x128xf32>
    %88 = arith.addf %87, %86 : vector<2x128xf32>
    %89 = arith.divf %87, %88 : vector<2x128xf32>
    %90 = arith.index_cast %arg1 : i32 to index
    %c1_49 = arith.constant 1 : index
    %91 = memref.load %arg2[%90, %c1_49] : memref<2x4xf32, #tpu.memory_space<smem>>
    %92 = vector.broadcast %91 : f32 to vector<2x128xf32>
    %93 = arith.mulf %92, %89 : vector<2x128xf32>
    %94 = arith.negf %93 : vector<2x128xf32>
    %95 = math.exp %94 : vector<2x128xf32>
    %cst_50 = arith.constant 1.000000e+00 : f32
    %96 = vector.broadcast %cst_50 : f32 to vector<2x128xf32>
    %97 = arith.addf %96, %95 : vector<2x128xf32>
    %98 = arith.divf %96, %97 : vector<2x128xf32>
    %c0_51 = arith.constant 0 : index
    %c1_52 = arith.constant 1 : index
    %c0_53 = arith.constant 0 : index
    %c0_54 = arith.constant 0 : index
    %99 = vector.load %arg8[%c0_51, %c1_52, %c0_53, %c0_54] : memref<1x4x2x128xf32, #tpu.memory_space<vmem>>, vector<1x1x2x128xf32>
    %100 = vector.shape_cast %99 : vector<1x1x2x128xf32> to vector<2x128xf32>
    %101 = vector.shape_cast %98 : vector<2x128xf32> to vector<1x1x2x128xf32>
    tpu.vector_store %arg8[%c0_51, %c1_52, %c0_53, %c0_54], %101 {strides = array<i32>} : memref<1x4x2x128xf32, #tpu.memory_space<vmem>>, vector<1x1x2x128xf32>,
    %c2_55 = arith.constant 2 : index
    %c0_56 = arith.constant 0 : index
    %102 = memref.load %arg5[%c2_55, %c0_56] : memref<4x2xf32, #tpu.memory_space<smem>>
    %103 = vector.broadcast %102 : f32 to vector<2x128xf32>
    %104 = arith.mulf %103, %27 : vector<2x128xf32>
    %c2_57 = arith.constant 2 : index
    %c1_58 = arith.constant 1 : index
    %105 = memref.load %arg5[%c2_57, %c1_58] : memref<4x2xf32, #tpu.memory_space<smem>>
    %106 = vector.broadcast %105 : f32 to vector<2x128xf32>
    %107 = arith.mulf %106, %47 : vector<2x128xf32>
    %108 = arith.addf %104, %107 : vector<2x128xf32>
    %c2_59 = arith.constant 2 : index
    %109 = memref.load %arg6[%c2_59] : memref<4xf32, #tpu.memory_space<smem>>
    %110 = vector.broadcast %109 : f32 to vector<2x128xf32>
    %111 = arith.addf %108, %110 : vector<2x128xf32>
    %112 = arith.negf %111 : vector<2x128xf32>
    %113 = math.exp %112 : vector<2x128xf32>
    %cst_60 = arith.constant 1.000000e+00 : f32
    %114 = vector.broadcast %cst_60 : f32 to vector<2x128xf32>
    %115 = arith.addf %114, %113 : vector<2x128xf32>
    %116 = arith.divf %114, %115 : vector<2x128xf32>
    %117 = arith.index_cast %arg1 : i32 to index
    %c2_61 = arith.constant 2 : index
    %118 = memref.load %arg2[%117, %c2_61] : memref<2x4xf32, #tpu.memory_space<smem>>
    %119 = vector.broadcast %118 : f32 to vector<2x128xf32>
    %120 = arith.mulf %119, %116 : vector<2x128xf32>
    %121 = arith.negf %120 : vector<2x128xf32>
    %122 = math.exp %121 : vector<2x128xf32>
    %cst_62 = arith.constant 1.000000e+00 : f32
    %123 = vector.broadcast %cst_62 : f32 to vector<2x128xf32>
    %124 = arith.addf %123, %122 : vector<2x128xf32>
    %125 = arith.divf %123, %124 : vector<2x128xf32>
    %c0_63 = arith.constant 0 : index
    %c2_64 = arith.constant 2 : index
    %c0_65 = arith.constant 0 : index
    %c0_66 = arith.constant 0 : index
    %126 = vector.load %arg8[%c0_63, %c2_64, %c0_65, %c0_66] : memref<1x4x2x128xf32, #tpu.memory_space<vmem>>, vector<1x1x2x128xf32>
    %127 = vector.shape_cast %126 : vector<1x1x2x128xf32> to vector<2x128xf32>
    %128 = vector.shape_cast %125 : vector<2x128xf32> to vector<1x1x2x128xf32>
    tpu.vector_store %arg8[%c0_63, %c2_64, %c0_65, %c0_66], %128 {strides = array<i32>} : memref<1x4x2x128xf32, #tpu.memory_space<vmem>>, vector<1x1x2x128xf32>,
    %c3_67 = arith.constant 3 : index
    %c0_68 = arith.constant 0 : index
    %129 = memref.load %arg5[%c3_67, %c0_68] : memref<4x2xf32, #tpu.memory_space<smem>>
    %130 = vector.broadcast %129 : f32 to vector<2x128xf32>
    %131 = arith.mulf %130, %27 : vector<2x128xf32>
    %c3_69 = arith.constant 3 : index
    %c1_70 = arith.constant 1 : index
    %132 = memref.load %arg5[%c3_69, %c1_70] : memref<4x2xf32, #tpu.memory_space<smem>>
    %133 = vector.broadcast %132 : f32 to vector<2x128xf32>
    %134 = arith.mulf %133, %47 : vector<2x128xf32>
    %135 = arith.addf %131, %134 : vector<2x128xf32>
    %c3_71 = arith.constant 3 : index
    %136 = memref.load %arg6[%c3_71] : memref<4xf32, #tpu.memory_space<smem>>
    %137 = vector.broadcast %136 : f32 to vector<2x128xf32>
    %138 = arith.addf %135, %137 : vector<2x128xf32>
    %139 = arith.negf %138 : vector<2x128xf32>
    %140 = math.exp %139 : vector<2x128xf32>
    %cst_72 = arith.constant 1.000000e+00 : f32
    %141 = vector.broadcast %cst_72 : f32 to vector<2x128xf32>
    %142 = arith.addf %141, %140 : vector<2x128xf32>
    %143 = arith.divf %141, %142 : vector<2x128xf32>
    %144 = arith.index_cast %arg1 : i32 to index
    %c3_73 = arith.constant 3 : index
    %145 = memref.load %arg2[%144, %c3_73] : memref<2x4xf32, #tpu.memory_space<smem>>
    %146 = vector.broadcast %145 : f32 to vector<2x128xf32>
    %147 = arith.mulf %146, %143 : vector<2x128xf32>
    %148 = arith.negf %147 : vector<2x128xf32>
    %149 = math.exp %148 : vector<2x128xf32>
    %cst_74 = arith.constant 1.000000e+00 : f32
    %150 = vector.broadcast %cst_74 : f32 to vector<2x128xf32>
    %151 = arith.addf %150, %149 : vector<2x128xf32>
    %152 = arith.divf %150, %151 : vector<2x128xf32>
    %c0_75 = arith.constant 0 : index
    %c3_76 = arith.constant 3 : index
    %c0_77 = arith.constant 0 : index
    %c0_78 = arith.constant 0 : index
    %153 = vector.load %arg8[%c0_75, %c3_76, %c0_77, %c0_78] : memref<1x4x2x128xf32, #tpu.memory_space<vmem>>, vector<1x1x2x128xf32>
    %154 = vector.shape_cast %153 : vector<1x1x2x128xf32> to vector<2x128xf32>
    %155 = vector.shape_cast %152 : vector<2x128xf32> to vector<1x1x2x128xf32>
    tpu.vector_store %arg8[%c0_75, %c3_76, %c0_77, %c0_78], %155 {strides = array<i32>} : memref<1x4x2x128xf32, #tpu.memory_space<vmem>>, vector<1x1x2x128xf32>,
    return
  }
  func.func @transform_0(%arg0: i32, %arg1: i32) -> (i32, i32) {
    %c0_i32 = arith.constant 0 : i32
    %c0_i32_0 = arith.constant 0 : i32
    %c0_i32_1 = arith.constant 0 : i32
    return %c0_i32, %c0_i32_0 : i32, i32
  }
  func.func @transform_1(%arg0: i32, %arg1: i32) -> (i32, i32) {
    %c0_i32 = arith.constant 0 : i32
    %c0_i32_0 = arith.constant 0 : i32
    %c0_i32_1 = arith.constant 0 : i32
    return %c0_i32, %c0_i32_0 : i32, i32
  }
  func.func @transform_2(%arg0: i32, %arg1: i32) -> i32 {
    %c0_i32 = arith.constant 0 : i32
    %c0_i32_0 = arith.constant 0 : i32
    return %c0_i32 : i32
  }
  func.func @transform_3(%arg0: i32, %arg1: i32) -> (i32, i32) {
    %c0_i32 = arith.constant 0 : i32
    %c0_i32_0 = arith.constant 0 : i32
    %c0_i32_1 = arith.constant 0 : i32
    return %c0_i32, %c0_i32_0 : i32, i32
  }
  func.func @transform_4(%arg0: i32, %arg1: i32) -> i32 {
    %c0_i32 = arith.constant 0 : i32
    %c0_i32_0 = arith.constant 0 : i32
    return %c0_i32 : i32
  }
  func.func @transform_5(%arg0: i32, %arg1: i32) -> (i32, i32, i32, i32) {
    %c0_i32 = arith.constant 0 : i32
    %c0_i32_0 = arith.constant 0 : i32
    %c0_i32_1 = arith.constant 0 : i32
    return %arg1, %c0_i32, %arg0, %c0_i32_0 : i32, i32, i32, i32
  }
  func.func @transform_6(%arg0: i32, %arg1: i32) -> (i32, i32, i32, i32) {
    %c0_i32 = arith.constant 0 : i32
    %c0_i32_0 = arith.constant 0 : i32
    %c0_i32_1 = arith.constant 0 : i32
    return %arg1, %c0_i32, %arg0, %c0_i32_0 : i32, i32, i32, i32
  }
}

</mosaic_0001>

<bundles_post_ra>
// kernel: attn_forward.1
= control target key start
LH: loop header
LB: loop body
LE: loop exit
PB: predicated region body
PF: predicated region fallthrough
CT: control target
= control target key end

     0   :  { %11 = vsyncpa [#allocation3], 0  ;;  %s1248_s0 = inlined_call_operand.vmem [shape: f32[2,4], index: 0, kind: input, shape index: {}]   ;;  %s1249_s1 = inlined_call_operand.vmem [shape: f32[2,4], index: 1, kind: input, shape index: {}]   ;;  %s1250_s2 = inlined_call_operand.vmem [shape: f32[2], index: 2, kind: input, shape index: {}]   ;;  %s1251_s3 = inlined_call_operand.vmem [shape: f32[4,2], index: 3, kind: input, shape index: {}]   ;;  %s1252_s4 = inlined_call_operand.vmem [shape: f32[4], index: 4, kind: input, shape index: {}]   ;;  %s1253_s5 = inlined_call_operand.vmem [shape: f32[2,4,2,128], index: 5, kind: input, shape index: {}]   ;;  %s1254_s6 = inlined_call_operand.vmem [shape: f32[2,4,2,128], index: 6, kind: output, shape index: {}]  }
   0x1   :  { %12 = vsyncpa [#allocation5], 0 }
   0x2   :  { %13 = vsyncpa [#allocation8], 0  ;;  %s1055_s21 = smov 0   ;;  %s1057_s22 = smov 0  }
   0x3   :  { %s1059_s23 = smov 0  }
   0x4 LB: > { %s219_s26 = sshll.u32 %s1249_s1, 4  ;;  %s741_s27 = sadd.s32 4294967295, %s1013_s23   ;;  %s1013_s23 = sphi %s1059_s23, %s19_s23   ;;  %s1009_s22 = sphi %s1057_s22, %s1277_s22   ;;  %s1005_s21 = sphi %s1055_s21, %s1276_s21   ;;  %s220_s26 = int_to_ptr.vmem [resolvable:$true] %s219_s26 }
   0x5   : > { %p743_p0 = scmp.ge.s32.totalorder %s1013_s23, 1  ;;  %p197_p1 = scmp.lt.s32.totalorder %s1013_s23, 3 }
   0x6   : > { %p1076_p2 = scmp.eq.s32.totalorder %s741_s27, 0  ;;  %s239_s8 = sshll.u32 %s1251_s3, 4  ;;  %s240_s8 = int_to_ptr.vmem [resolvable:$true] %s239_s8 }
   0x7   : > { %p1080_p3 = pnand %p743_p0, %p197_p1  ;;  %s28_s10 = sadd.s32 1, %s1009_s22 }
   0x8   : > { %s209_s13 = sshll.u32 %s1248_s0, 4  ;;  %p29_p6 = scmp.ge.s32.totalorder %s28_s10, 2  ;;  %s210_s13 = int_to_ptr.vmem [resolvable:$true] %s209_s13 }
   0x9   : > { %p817_p4 = pneg %p1080_p3  ;;  %s1015_s14 = smov [#allocation4]  }
   0xa   : > { %s1016_s15 = smov [#allocation7]   ;;  %s1279_s10 = smov (%p29_p6, %s28_s10), 0 }
   0xb   : > { %p1091_p5 = pnand %p1076_p2, %p817_p4  ;;  %s1017_s16 = smov [#allocation2]  }
   0xc   : > { %s229_s19 = sshll.u32 %s1250_s2, 4  ;;  %s249_s25 = sshll.u32 %s1252_s4, 4  ;;  %s230_s19 = int_to_ptr.vmem [resolvable:$true] %s229_s19  ;;  %s250_s25 = int_to_ptr.vmem [resolvable:$true] %s249_s25 }
   0xd   : > { %823 = dma.vmem_to_smem (!%p1091_p5), %s220_s26, 32, %s1015_s14, [#allocation5]  }
   0xe   : > { %829 = dma.vmem_to_smem (!%p1091_p5), %s240_s8, 64, %s1016_s15, [#allocation8]  }
   0xf   : > { %820 = dma.vmem_to_smem (!%p1091_p5), %s210_s13, 32, %s1017_s16, [#allocation3]  }
  0x10   : > { %s1018_s27 = smov [#allocation6]   ;;  %s1019_s26 = smov [#allocation9]  }
  0x11   : > { %826 = dma.vmem_to_smem (!%p1091_p5), %s230_s19, 16, %s1018_s27, [#allocation5]  }
  0x12   : > { %832 = dma.vmem_to_smem (!%p1091_p5), %s250_s25, 16, %s1019_s26, [#allocation8]  }
  0x13   : > { %273 = sbr.rel (%p1080_p3) target bundleno = 126 (0x7e), region = 44 }
  0x18   : > { %992 = dma.done.wait (%p1076_p2), [#allocation3], 32  }
  0x19   : > { %994 = vsyncadd (%p1076_p2), [#allocation3], 4294967264 }
  0x1a   : > { %996 = dma.done.wait (%p1076_p2), [#allocation5], 48  }
  0x1b   : > { %998 = vsyncadd (%p1076_p2), [#allocation5], 4294967248 }
  0x1c   : > { %1000 = dma.done.wait (%p1076_p2), [#allocation8], 80  }
  0x1d   : > { %1002 = vsyncadd (%p1076_p2), [#allocation8], 4294967216 }
  0x1e   : > { %300 = sfence }
  0x1f   : > { %p331_p7 = scmp.lt.s32.totalorder %s1005_s21, 1  ;;  %s354_s29 = sld [smem:[#allocation4]] }
  0x20   : > { %s763_s30 = sld [smem:[#allocation4 + $0x1]] }
  0x21   : > { %s1133_s7 = scalar_select %p331_p7, %s1005_s21, 1 }
  0x22   : > { %s764_s8 = sld [smem:[#allocation4 + $0x2]] }
  0x23   : > { %s795_s9 = sshll.u32 %s1133_s7, 3  ;;  %s765_s11 = sld [smem:[#allocation4 + $0x3]] }
  0x24   : > { %s338_s14 = scalar_lea.vmem %s1253_s5, %s795_s9  ;;  %s369_s28 = sld [smem:[#allocation6]] }
  0x25   : > { %v347_v0 = vld [vmem:[%s338_s14] sm:$0x3]  ;;  %v760_v1 = vld [vmem:[%s338_s14 + $0x2] sm:$0x3]  ;;  %v355_v2 = vstv %s354_s29  ;;  %v761_v3 = vld [vmem:[%s338_s14 + $0x4] sm:$0x3] }
  0x26   : > { %v356_v4 = vmul.f32 %v355_v2, %v347_v0  ;;  %v358_v5 = vstv %s763_s30  ;;  %v762_v6 = vld [vmem:[%s338_s14 + $0x6] sm:$0x3]  ;;  %s766_s15 = sld [smem:[#allocation4 + $0x80]] }
  0x27   : > { %v359_v7 = vmul.f32 %v760_v1, %v358_v5  ;;  %s767_s16 = sld [smem:[#allocation4 + $0x81]] }
  0x28   : > { %v362_v8 = vstv %s764_s8  ;;  %s768_s17 = sld [smem:[#allocation4 + $0x82]] }
  0x29   : > { %v360_v9 = vadd.f32 %v359_v7, %v356_v4  ;;  %v363_v10 = vmul.f32 %v761_v3, %v362_v8  ;;  %v366_v11 = vstv %s765_s11  ;;  %s769_s18 = sld [smem:[#allocation4 + $0x83]] }
  0x2a   : > { %v367_v12 = vmul.f32 %v762_v6, %v366_v11  ;;  %s770_s19 = sld [smem:[#allocation6 + $0x1]]  ;;  %v370_v16 = vstv %s369_s28  ;;  %s1154_s28 = sshll.u32 %s1005_s21, 7 }
  0x2b   : > { %v364_v13 = vadd.f32 %v363_v10, %v360_v9  ;;  %s1141_s20 = sld [smem:[#allocation7]]  ;;  %s528_s21 = sadd.s32 2, %s1154_s28 }
  0x2c   : > { %v374_v15 = vstv %s766_s15  ;;  %s1143_s24 = sld [smem:[#allocation7 + $0x1]]  ;;  %s474_s15 = sadd.s32 1, %s1154_s28 }
  0x2d   : > { %v368_v14 = vadd.f32 %v367_v12, %v364_v13  ;;  %v375_v17 = vmul.f32 %v374_v15, %v347_v0  ;;  %v377_v18 = vstv %s767_s16  ;;  %s1145_s25 = sld [smem:[#allocation9]] }
  0x2e   : > { %v378_v19 = vmul.f32 %v760_v1, %v377_v18  ;;  %v381_v20 = vstv %s768_s17  ;;  %s775_s27 = sld [smem:[#allocation7 + $0x80]] }
  0x2f   : > { %v382_v21 = vmul.f32 %v761_v3, %v381_v20  ;;  %v385_v22 = vstv %s769_s18  ;;  %v371_v23 = vadd.f32 %v370_v16, %v368_v14  ;;  %s776_s26 = sld [smem:[#allocation7 + $0x81]] }
  0x30   : > { %v379_v24 = vadd.f32 %v378_v19, %v375_v17  ;;  %v386_v25 = vmul.f32 %v762_v6, %v385_v22  ;;  %s1147_s29 = sld [smem:[#allocation9 + $0x1]]  ;;  %v389_v27 = vstv %s770_s19  ;;  %s582_s19 = sadd.s32 3, %s1154_s28 }
  0x31   : > { %s781_s30 = sld [smem:[#allocation7 + $0x100]]  ;;  %v372_v28 = vmax.f32 %v371_v23, 0.0  ;;  %v393_v30 = vstv %s1141_s20 }
  0x32   : > { %v383_v26 = vadd.f32 %v382_v21, %v379_v24  ;;  %s782_s8 = sld [smem:[#allocation7 + $0x101]]  ;;  %v396_v33 = vstv %s1143_s24 }
  0x33   : > { %s783_s11 = sld [smem:[#allocation9 + $0x2]]  ;;  %v394_v36 = vmul.f32 %v393_v30, %v372_v28  ;;  %v400_v44 = vstv %s1145_s25 }
  0x34   : > { %v387_v29 = vadd.f32 %v386_v25, %v383_v26  ;;  %v446_v31 = vstv %s775_s27  ;;  %s787_s12 = sld [smem:[#allocation7 + $0x180]]  ;;  %s346_s27 = scalar_lea.vmem %s1254_s6, %s795_s9 }
  0x35   : > { %s788_s13 = sld [smem:[#allocation7 + $0x181]]  ;;  %v449_v34 = vstv %s776_s26  ;;  %v447_v37 = vmul.f32 %v446_v31, %v372_v28 }
  0x36   : > { %v390_v32 = vadd.f32 %v389_v27, %v387_v29  ;;  %s789_s14 = sld [smem:[#allocation9 + $0x3]]  ;;  %v453_v45 = vstv %s1147_s29 }
  0x37   : > { %v500_v38 = vstv %s781_s30  ;;  %s1158_s16 = sld [smem:[#allocation2 + %s1154_s28]] }
  0x38   : > { %v391_v35 = vmax.f32 %v390_v32, 0.0  ;;  %v501_v39 = vmul.f32 %v500_v38, %v372_v28  ;;  %v503_v40 = vstv %s782_s8  ;;  %s1160_s17 = sld [smem:[#allocation2 + %s474_s15]] }
  0x39   : > { %v507_v46 = vstv %s783_s11  ;;  %s1164_s18 = sld [smem:[#allocation2 + %s528_s21]] }
  0x3a   : > { %v397_v41 = vmul.f32 %v396_v33, %v391_v35  ;;  %v450_v42 = vmul.f32 %v449_v34, %v391_v35  ;;  %v504_v43 = vmul.f32 %v503_v40, %v391_v35  ;;  %v554_v47 = vstv %s787_s12  ;;  %s1172_s20 = sld [smem:[#allocation2 + %s582_s19]] }
  0x3b   : > { %v555_v51 = vmul.f32 %v554_v47, %v372_v28  ;;  %v557_v52 = vstv %s788_s13 }
  0x3c   : > { %v398_v48 = vadd.f32 %v397_v41, %v394_v36  ;;  %v451_v49 = vadd.f32 %v450_v42, %v447_v37  ;;  %v505_v50 = vadd.f32 %v504_v43, %v501_v39  ;;  %v558_v56 = vmul.f32 %v557_v52, %v391_v35 }
  0x3d   : > { %v561_v57 = vstv %s789_s14  ;;  %v423_v11 = vstv %s1158_s16 }
  0x3e   : > { %v401_v53 = vadd.f32 %v400_v44, %v398_v48  ;;  %v454_v54 = vadd.f32 %v453_v45, %v451_v49  ;;  %v508_v55 = vadd.f32 %v507_v46, %v505_v50  ;;  %v559_v61 = vadd.f32 %v558_v56, %v555_v51 }
  0x3f   : > { %v476_v15 = vstv %s1160_s17  ;;  %v530_v40 = vstv %s1164_s18 }
  0x40   : > { %v772_v58 = vmul.f32 -1.442695, %v401_v53  ;;  %v778_v59 = vmul.f32 -1.442695, %v454_v54  ;;  %v784_v60 = vmul.f32 -1.442695, %v508_v55  ;;  %v562_v62 = vadd.f32 %v561_v57, %v559_v61 }
  0x41   : > { %v584_v55 = vstv %s1172_s20 }
  0x42   : > { %872 = vpow2.f32 %v772_v58  ;;  %v790_v63 = vmul.f32 -1.442695, %v562_v62 }
  0x43   : > { %874 = vpow2.f32 %v778_v59 }
  0x44   : > { %876 = vpow2.f32 %v784_v60 }
  0x45   : > { %878 = vpow2.f32 %v790_v63 }
  0x48   : > { %v873_v0 = vpop.eup %872 }
  0x49   : > { %v875_v1 = vpop.eup %874  ;;  %v405_v2 = vadd.f32 1.0, %v873_v0 }
  0x4a   : > { %v877_v3 = vpop.eup %876  ;;  %v458_v4 = vadd.f32 1.0, %v875_v1 }
  0x4b   : > { %880 = vrcp.f32 %v405_v2  ;;  %v879_v5 = vpop.eup %878  ;;  %v512_v6 = vadd.f32 1.0, %v877_v3  ;;  %v415_v8 = vand.u32 2147483647, %v405_v2  ;;  %v417_v9 = vand.u32 2147483648, %v405_v2 }
  0x4c   : > { %882 = vrcp.f32 %v458_v4  ;;  %v566_v7 = vadd.f32 1.0, %v879_v5  ;;  %v470_v12 = vand.u32 2147483648, %v458_v4  ;;  %vm411_vm0 = vweird.f32 %v405_v2 }
  0x4d   : > { %884 = vrcp.f32 %v512_v6  ;;  %vm464_vm1 = vweird.f32 %v458_v4  ;;  %vm1168_vm2 = vcmp.eq.f32.partialorder %v415_v8, 8.507059e+37  ;;  %v418_v17 = vor.u32 1.1754944e-38, %v417_v9 }
  0x4e   : > { %886 = vrcp.f32 %v566_v7  ;;  %v468_v19 = vand.u32 2147483647, %v458_v4  ;;  %vm518_vm4 = vweird.f32 %v512_v6  ;;  %v522_v22 = vand.u32 2147483647, %v512_v6 }
  0x4f   : > { %v471_v25 = vor.u32 1.1754944e-38, %v470_v12  ;;  %v524_v28 = vand.u32 2147483648, %v512_v6  ;;  %vm572_vm6 = vweird.f32 %v566_v7  ;;  %v578_v33 = vand.u32 2147483648, %v566_v7 }
  0x50   : > { %v576_v37 = vand.u32 2147483647, %v566_v7  ;;  %vm469_vm11 = vcmp.eq.f32.partialorder %v468_v19, 8.507059e+37  ;;  %vm1192_vm13 = vcmp.eq.f32.partialorder %v522_v22, 8.507059e+37 }
  0x51   : > { %v881_v10 = vpop.eup %880  ;;  %v525_v44 = vor.u32 1.1754944e-38, %v524_v28  ;;  %v579_v49 = vor.u32 1.1754944e-38, %v578_v33 }
  0x52   : > { %v883_v13 = vpop.eup %882  ;;  %v407_v14 = vmul.f32 %v881_v10, %v405_v2  ;;  %vm412_vm3 = vweird.f32 %v881_v10  ;;  %vm577_vm15 = vcmp.eq.f32.partialorder %v576_v37, 8.507059e+37 }
  0x53   : > { %v460_v18 = vmul.f32 %v883_v13, %v458_v4  ;;  %v885_v20 = vpop.eup %884  ;;  %vm465_vm5 = vweird.f32 %v883_v13  ;;  %vm1175_vm7 = vmor %vm411_vm0, %vm412_vm3 }
  0x54   : > { %v408_v21 = vsub.f32 1.0, %v407_v14  ;;  %v887_v23 = vpop.eup %886  ;;  %v514_v26 = vmul.f32 %v885_v20, %v512_v6  ;;  %vm519_vm8 = vweird.f32 %v885_v20  ;;  %vm1180_vm9 = vmor %vm464_vm1, %vm465_vm5 }
  0x55   : > { %v461_v24 = vsub.f32 1.0, %v460_v18  ;;  %v568_v29 = vmul.f32 %v887_v23, %v566_v7  ;;  %vm573_vm10 = vweird.f32 %v887_v23  ;;  %vm1188_vm12 = vmor %vm518_vm4, %vm519_vm8 }
  0x56   : > { %v409_v27 = vmul.f32 %v881_v10, %v408_v21  ;;  %v515_v32 = vsub.f32 1.0, %v514_v26  ;;  %vm574_vm14 = vmor %vm572_vm6, %vm573_vm10 }
  0x57   : > { %v462_v31 = vmul.f32 %v883_v13, %v461_v24  ;;  %v569_v36 = vsub.f32 1.0, %v568_v29 }
  0x58   : > { %v410_v34 = vadd.f32 %v881_v10, %v409_v27  ;;  %v516_v39 = vmul.f32 %v885_v20, %v515_v32 }
  0x59   : > { %v463_v38 = vadd.f32 %v883_v13, %v462_v31  ;;  %v570_v45 = vmul.f32 %v887_v23, %v569_v36 }
  0x5a   : > { %v414_v41 = vsel %vm1175_vm7, %v881_v10, %v410_v34  ;;  %v517_v48 = vadd.f32 %v885_v20, %v516_v39 }
  0x5b   : > { %v419_v46 = vsel %vm1168_vm2, %v418_v17, %v414_v41  ;;  %v467_v47 = vsel %vm1180_vm9, %v883_v13, %v463_v38  ;;  %v571_v52 = vadd.f32 %v887_v23, %v570_v45 }
  0x5c   : > { %v424_v50 = vmul.f32 %v423_v11, %v419_v46  ;;  %v472_v51 = vsel %vm469_vm11, %v471_v25, %v467_v47  ;;  %v521_v54 = vsel %vm1188_vm12, %v885_v20, %v517_v48 }
  0x5d   : > { %v477_v53 = vmul.f32 %v476_v15, %v472_v51  ;;  %v526_v57 = vsel %vm1192_vm13, %v525_v44, %v521_v54  ;;  %v575_v58 = vsel %vm574_vm14, %v887_v23, %v571_v52 }
  0x5e   : > { %v774_v56 = vmul.f32 -1.442695, %v424_v50  ;;  %v531_v60 = vmul.f32 %v530_v40, %v526_v57  ;;  %v580_v61 = vsel %vm577_vm15, %v579_v49, %v575_v58 }
  0x5f   : > { %v779_v59 = vmul.f32 -1.442695, %v477_v53  ;;  %v585_v62 = vmul.f32 %v584_v55, %v580_v61 }
  0x60   : > { %888 = vpow2.f32 %v774_v56  ;;  %v785_v63 = vmul.f32 -1.442695, %v531_v60 }
  0x61   : > { %890 = vpow2.f32 %v779_v59  ;;  %v791_v0 = vmul.f32 -1.442695, %v585_v62 }
  0x62   : > { %892 = vpow2.f32 %v785_v63 }
  0x63   : > { %894 = vpow2.f32 %v791_v0 }
  0x66   : > { %v889_v1 = vpop.eup %888 }
  0x67   : > { %v891_v2 = vpop.eup %890  ;;  %v428_v3 = vadd.f32 1.0, %v889_v1 }
  0x68   : > { %v481_v4 = vadd.f32 1.0, %v891_v2  ;;  %v893_v5 = vpop.eup %892 }
  0x69   : > { %896 = vrcp.f32 %v428_v3  ;;  %v895_v6 = vpop.eup %894  ;;  %v535_v7 = vadd.f32 1.0, %v893_v5  ;;  %v438_v9 = vand.u32 2147483647, %v428_v3  ;;  %v440_v10 = vand.u32 2147483648, %v428_v3 }
  0x6a   : > { %898 = vrcp.f32 %v481_v4  ;;  %v589_v8 = vadd.f32 1.0, %v895_v6  ;;  %v491_v12 = vand.u32 2147483647, %v481_v4  ;;  %v493_v13 = vand.u32 2147483648, %v481_v4 }
  0x6b   : > { %900 = vrcp.f32 %v535_v7  ;;  %vm434_vm0 = vweird.f32 %v428_v3  ;;  %vm487_vm1 = vweird.f32 %v481_v4  ;;  %vm1206_vm3 = vcmp.eq.f32.partialorder %v438_v9, 8.507059e+37 }
  0x6c   : > { %902 = vrcp.f32 %v589_v8  ;;  %v441_v19 = vor.u32 1.1754944e-38, %v440_v10  ;;  %vm1210_vm5 = vcmp.eq.f32.partialorder %v491_v12, 8.507059e+37  ;;  %v494_v23 = vor.u32 1.1754944e-38, %v493_v13 }
  0x6d   : > { %vm541_vm6 = vweird.f32 %v535_v7  ;;  %v545_v27 = vand.u32 2147483647, %v535_v7  ;;  %v547_v30 = vand.u32 2147483648, %v535_v7  ;;  %vm595_vm8 = vweird.f32 %v589_v8 }
  0x6e   : > { %v601_v35 = vand.u32 2147483648, %v589_v8  ;;  %v599_v38 = vand.u32 2147483647, %v589_v8 }
  0x6f   : > { %v897_v11 = vpop.eup %896  ;;  %v548_v43 = vor.u32 1.1754944e-38, %v547_v30  ;;  %vm546_vm13 = vcmp.eq.f32.partialorder %v545_v27, 8.507059e+37 }
  0x70   : > { %v899_v14 = vpop.eup %898  ;;  %v430_v15 = vmul.f32 %v897_v11, %v428_v3  ;;  %vm435_vm2 = vweird.f32 %v897_v11  ;;  %v602_v47 = vor.u32 1.1754944e-38, %v601_v35  ;;  %vm600_vm15 = vcmp.eq.f32.partialorder %v599_v38, 8.507059e+37 }
  0x71   : > { %v483_v16 = vmul.f32 %v899_v14, %v481_v4  ;;  %v901_v20 = vpop.eup %900  ;;  %vm488_vm4 = vweird.f32 %v899_v14  ;;  %vm1215_vm7 = vmor %vm434_vm0, %vm435_vm2 }
  0x72   : > { %v431_v17 = vsub.f32 1.0, %v430_v15  ;;  %v903_v24 = vpop.eup %902  ;;  %v537_v26 = vmul.f32 %v901_v20, %v535_v7  ;;  %vm1220_vm9 = vmor %vm487_vm1, %vm488_vm4  ;;  %vm542_vm10 = vweird.f32 %v901_v20 }
  0x73   : > { %v484_v21 = vsub.f32 1.0, %v483_v16  ;;  %v591_v31 = vmul.f32 %v903_v24, %v589_v8  ;;  %vm596_vm11 = vweird.f32 %v903_v24  ;;  %vm543_vm12 = vmor %vm541_vm6, %vm542_vm10 }
  0x74   : > { %v432_v25 = vmul.f32 %v897_v11, %v431_v17  ;;  %v538_v34 = vsub.f32 1.0, %v537_v26  ;;  %vm597_vm14 = vmor %vm595_vm8, %vm596_vm11 }
  0x75   : > { %v485_v29 = vmul.f32 %v899_v14, %v484_v21  ;;  %v592_v37 = vsub.f32 1.0, %v591_v31 }
  0x76   : > { %v433_v32 = vadd.f32 %v897_v11, %v432_v25  ;;  %v539_v40 = vmul.f32 %v901_v20, %v538_v34 }
  0x77   : > { %v486_v36 = vadd.f32 %v899_v14, %v485_v29  ;;  %v593_v44 = vmul.f32 %v903_v24, %v592_v37 }
  0x78   : > { %v437_v39 = vsel %vm1215_vm7, %v897_v11, %v433_v32  ;;  %v540_v46 = vadd.f32 %v901_v20, %v539_v40 }
  0x79   : > { %v442_v41 = vsel %vm1206_vm3, %v441_v19, %v437_v39  ;;  %v490_v42 = vsel %vm1220_vm9, %v899_v14, %v486_v36  ;;  %v594_v48 = vadd.f32 %v903_v24, %v593_v44 }
  0x7a   : > { %444 = vst [vmem:[%s346_s27] sm:$0x3] %v442_v41  ;;  %v495_v45 = vsel %vm1210_vm5, %v494_v23, %v490_v42  ;;  %v544_v49 = vsel %vm543_vm12, %v901_v20, %v540_v46 }
  0x7b   : > { %780 = vst [vmem:[%s346_s27 + $0x2] sm:$0x3] %v495_v45  ;;  %v549_v50 = vsel %vm546_vm13, %v548_v43, %v544_v49  ;;  %v598_v51 = vsel %vm597_vm14, %v903_v24, %v594_v48 }
  0x7c   : > { %786 = vst [vmem:[%s346_s27 + $0x4] sm:$0x3] %v549_v50  ;;  %v603_v52 = vsel %vm600_vm15, %v602_v47, %v598_v51 }
  0x7d   : > { %792 = vst [vmem:[%s346_s27 + $0x6] sm:$0x3] %v603_v52 }
  0x7e PF: > { %s19_s23 = sadd.s32 1, %s1013_s23   ;;  %s1276_s21 = smov %s1009_s22 }
  0x7f   : > { %p16_p8 = scmp.ge.s32.totalorder %s19_s23, 4   ;;  %s1277_s22 = smov %s1279_s10 }
  0x81   :  { %18 = sbr.rel (!%p16_p8) target bundleno = 4 (0x4), region = 101 }
  0x86   :  { %634 = vsyncpa [#allocation3], 1 }
  0x87   :  { %636 = vsyncpa [#allocation3 + $0x1], 1 }
  0x88   :  { %637 = vsyncpa [#allocation5], 1 }
  0x89   :  { %638 = vsyncpa [#allocation8], 1 }

</bundles_post_ra>
